<compile_context>
chip_gen: v7x
topology: tpu7x:2x2x1
jax: 0.10.0
libtpu: 0.0.40
codegen_flags: <defaults>
</compile_context>

<pallas_src>
import math

import jax
import jax.numpy as jnp
from jax import lax
from jax.experimental import pallas as pl
from jax.experimental.pallas import tpu as pltpu

# ---------------------------------------------------------------------------
# Model hyper-parameters (small, consistent with Block(embed_dim, num_heads))
# ---------------------------------------------------------------------------
SEQ = 8          # sequence length  (len(x) in the PyTorch forward)
BATCH = 2        # batch size
EMBED = 32       # embed_dim
HEADS = 4        # num_heads
HEAD_DIM = EMBED // HEADS
HIDDEN = 4 * EMBED
LN_EPS = 1e-5
LANE = 128       # width of one row in the packed bias/LN slab


# ---------------------------------------------------------------------------
# Pallas kernel: the full transformer block, both batch elements, one call
# ---------------------------------------------------------------------------
def _block_kernel(x_ref,      # (N*S, E)   batch-major, lane-dense
                  vec_ref,    # (8, 128)   rows: ln1_w, ln1_b, bqkv, bo, ln2_w, ln2_b, b1, b2
                  w_ref,      # (E, 3E+E+4E) = (32, 256): [Wqkv | Wo | W1] (pre-transposed)
                  w2_ref,     # (4E, E) = (128, 32)       W2 (pre-transposed)
                  o_ref):     # (N*S, E)
    S, N, E, H, D = SEQ, BATCH, EMBED, HEADS, HEAD_DIM
    NS = N * S

    x2d = x_ref[...]                 # (16, 32)
    vecs = vec_ref[...]              # (8, 128)
    w = w_ref[...]                   # (32, 256)
    w2 = w2_ref[...]                 # (128, 32)

    # Bias / LN vectors: one row each, lane offset 0 (no lane rotates).
    ln1w = vecs[0:1, :E]
    ln1b = vecs[1:2, :E]
    bqkv = vecs[2:3, :3 * E]         # Q part already carries the 1/sqrt(D) scale
    bo = vecs[3:4, :E]
    ln2w = vecs[4:5, :E]
    ln2b = vecs[5:6, :E]
    b1 = vecs[6:7, :HIDDEN]
    b2 = vecs[7:8, :E]

    # 32-row weights sliced from the packed slab.
    wqkv = w[:, 0:3 * E]             # (32, 96)
    wo = w[:, 3 * E:4 * E]           # (32, 32)
    w1 = w[:, 4 * E:4 * E + HIDDEN]  # (32, 128)

    def layernorm(v, gamma, beta):
        mu = jnp.mean(v, axis=-1, keepdims=True)
        var = jnp.mean((v - mu) ** 2, axis=-1, keepdims=True)
        return (v - mu) * lax.rsqrt(var + LN_EPS) * gamma + beta

    # ---- ln_1 + QKV projection on the stacked (N*S, E) matrix --------------
    xn = layernorm(x2d, ln1w, ln1b)                                        # (16, 32)
    qkv = jnp.dot(xn, wqkv, preferred_element_type=jnp.float32) + bqkv     # (16, 96)
    qkv3 = qkv.reshape(N, S, 3 * E)  # tile-aligned split of the sublane dim

    # Additive causal mask built once (-1e30 instead of -inf; safe with the
    # max-subtracted softmax, identical result).
    row = lax.broadcasted_iota(jnp.int32, (S, S), 0)
    col = lax.broadcasted_iota(jnp.int32, (S, S), 1)
    mask = jnp.where(col > row, jnp.float32(-1e30), jnp.float32(0.0))      # (S, S)

    # ---- attention: per head, batched over the batch dim -------------------
    a = jnp.zeros((NS, E), jnp.float32)
    for h in range(H):
        q = qkv3[:, :, h * D:(h + 1) * D]                    # (N, S, D)
        k = qkv3[:, :, E + h * D:E + (h + 1) * D]            # (N, S, D)
        v = qkv3[:, :, 2 * E + h * D:2 * E + (h + 1) * D]    # (N, S, D)
        s = jnp.einsum('nsd,ntd->nst', q, k,
                       preferred_element_type=jnp.float32) + mask           # (N, S, S)
        m = jnp.max(s, axis=-1, keepdims=True)
        p = jnp.exp(s - m)
        p = p / jnp.sum(p, axis=-1, keepdims=True)            # exact divide (correctness)
        ctx = jnp.einsum('nst,ntd->nsd', p, v,
                         preferred_element_type=jnp.float32)                # (N, S, D)
        # Output projection folded per head, accumulated on the stacked rows.
        a = a + jnp.dot(ctx.reshape(NS, D), wo[h * D:(h + 1) * D, :],
                        preferred_element_type=jnp.float32)
    a = a + bo

    # Residual on the ln_1 OUTPUT (exactly as the PyTorch forward does).
    x1 = xn + a

    # ---- MLP: Linear -> GELU(exact erf) -> Linear, residual ----------------
    x1n = layernorm(x1, ln2w, ln2b)
    h1 = jnp.dot(x1n, w1, preferred_element_type=jnp.float32) + b1          # (16, 128)
    g = 0.5 * h1 * (1.0 + lax.erf(h1 * jnp.float32(1.0 / math.sqrt(2.0))))
    mlp = jnp.dot(g, w2, preferred_element_type=jnp.float32) + b2           # (16, 32)

    o_ref[...] = x1 + mlp


# ---------------------------------------------------------------------------
# One-time weight preparation: transpose, fold the softmax scale into Q, and
# pack the 13 parameter arrays into 3 slabs (3 DMAs instead of 13).
# ---------------------------------------------------------------------------
def prepare_kernel_params(p):
    scale = jnp.float32(1.0 / math.sqrt(HEAD_DIM))
    wqkv_t = p["in_proj_w"].T                                  # (E, 3E): y = x @ W + b
    bqkv = p["in_proj_b"]
    wqkv_t = wqkv_t.at[:, :EMBED].multiply(scale)              # fold 1/sqrt(D) into Q
    bqkv = bqkv.at[:EMBED].multiply(scale)

    def row(v):
        return jnp.pad(v, (0, LANE - v.shape[0]))

    vec_slab = jnp.stack([
        row(p["ln1_w"]), row(p["ln1_b"]),
        row(bqkv), row(p["out_proj_b"]),
        row(p["ln2_w"]), row(p["ln2_b"]),
        row(p["fc1_b"]), row(p["fc2_b"]),
    ], axis=0).astype(jnp.float32)                             # (8, 128)

    w_slab = jnp.concatenate(
        [wqkv_t, p["out_proj_w"].T, p["fc1_w"].T], axis=1
    ).astype(jnp.float32)                                      # (32, 256)

    w2 = p["fc2_w"].T.astype(jnp.float32)                      # (128, 32)
    return vec_slab, w_slab, w2


def block_forward(x, vec_slab, w_slab, w2):
    """x: (S, N, E) float32 -> (S, N, E) float32.

    Single pallas_call, no grid. The cheap (2 KB) batch-major transpose happens
    in the wrapper so the kernel sees a contiguous lane-dense (N*S, E) tile.
    """
    S, N, E = x.shape
    x2d = jnp.transpose(x, (1, 0, 2)).reshape(N * S, E)
    vmem = pl.BlockSpec(memory_space=pltpu.MemorySpace.VMEM)
    o2d = pl.pallas_call(
        _block_kernel,
        out_shape=jax.ShapeDtypeStruct((N * S, E), jnp.float32),
        in_specs=[vmem, vmem, vmem, vmem],
        out_specs=vmem,
    )(x2d, vec_slab, w_slab, w2)
    return jnp.transpose(o2d.reshape(N, S, E), (1, 0, 2))


# ---------------------------------------------------------------------------
# Pure-JAX reference (mirrors the PyTorch math) for a sanity check
# ---------------------------------------------------------------------------
def block_reference(x, p):
    S, N, E = x.shape

    def ln(v, w, b):
        mu = jnp.mean(v, axis=-1, keepdims=True)
        var = jnp.mean((v - mu) ** 2, axis=-1, keepdims=True)
        return (v - mu) / jnp.sqrt(var + LN_EPS) * w + b

    xn = ln(x, p["ln1_w"], p["ln1_b"])                                  # (S, N, E)
    qkv = jnp.einsum("snE,FE->snF", xn, p["in_proj_w"]) + p["in_proj_b"]
    q, k, v = jnp.split(qkv, 3, axis=-1)
    q = q.reshape(S, N, HEADS, HEAD_DIM) / math.sqrt(HEAD_DIM)
    k = k.reshape(S, N, HEADS, HEAD_DIM)
    v = v.reshape(S, N, HEADS, HEAD_DIM)
    s = jnp.einsum("snhd,tnhd->nhst", q, k)
    mask = jnp.triu(jnp.full((S, S), -jnp.inf, jnp.float32), k=1)
    s = s + mask
    pattn = jax.nn.softmax(s, axis=-1)
    o = jnp.einsum("nhst,tnhd->snhd", pattn, v).reshape(S, N, E)
    a = jnp.einsum("snE,FE->snF", o, p["out_proj_w"]) + p["out_proj_b"]
    x1 = xn + a
    x1n = ln(x1, p["ln2_w"], p["ln2_b"])
    h1 = jnp.einsum("snE,FE->snF", x1n, p["fc1_w"]) + p["fc1_b"]
    g = 0.5 * h1 * (1.0 + lax.erf(h1 / math.sqrt(2.0)))
    m = jnp.einsum("snF,EF->snE", g, p["fc2_w"]) + p["fc2_b"]
    return x1 + m


# ---------------------------------------------------------------------------
# Deterministic parameter init (PyTorch shapes)
# ---------------------------------------------------------------------------
def init_params(key):
    ks = jax.random.split(key, 6)
    f32 = jnp.float32
    return {
        "ln1_w": jnp.ones((EMBED,), f32),
        "ln1_b": jnp.zeros((EMBED,), f32),
        "ln2_w": jnp.ones((EMBED,), f32),
        "ln2_b": jnp.zeros((EMBED,), f32),
        "in_proj_w": 0.05 * jax.random.normal(ks[0], (3 * EMBED, EMBED), f32),
        "in_proj_b": 0.01 * jax.random.normal(ks[1], (3 * EMBED,), f32),
        "out_proj_w": 0.05 * jax.random.normal(ks[2], (EMBED, EMBED), f32),
        "out_proj_b": jnp.zeros((EMBED,), f32),
        "fc1_w": 0.05 * jax.random.normal(ks[3], (HIDDEN, EMBED), f32),
        "fc1_b": 0.01 * jax.random.normal(ks[4], (HIDDEN,), f32),
        "fc2_w": 0.05 * jax.random.normal(ks[5], (EMBED, HIDDEN), f32),
        "fc2_b": jnp.zeros((EMBED,), f32),
    }


if __name__ == "__main__":
    key = jax.random.PRNGKey(0)
    kx, kp = jax.random.split(key)
    x = jax.random.normal(kx, (SEQ, BATCH, EMBED), jnp.float32)   # (S, N, E)
    params = init_params(kp)
    vec_slab, w_slab, w2 = prepare_kernel_params(params)          # one-time prep

    out = jax.block_until_ready(block_forward(x, vec_slab, w_slab, w2))

    ref = block_reference(x, params)
    assert out.shape == (SEQ, BATCH, EMBED)
    err = float(jnp.max(jnp.abs(out - ref)))
    # Exact softmax divide now (no approx reciprocal) -> tight tolerance.
    assert jnp.allclose(out, ref, atol=5e-4, rtol=5e-4), err

    print("KERNEL_OK")
</pallas_src>

<mosaic_0001>
module attributes {stable_mosaic.version = 11 : i64} {
  func.func @_block_kernel(%arg0: memref<16x32xf32, #tpu.memory_space<vmem>>, %arg1: memref<8x128xf32, #tpu.memory_space<vmem>>, %arg2: memref<32x256xf32, #tpu.memory_space<vmem>>, %arg3: memref<128x32xf32, #tpu.memory_space<vmem>>, %arg4: memref<16x32xf32, #tpu.memory_space<vmem>>) attributes {dimension_semantics = [], scalar_prefetch = 0 : i64, scratch_operands = 0 : i64, tpu.core_type = #tpu.core_type<tc>} {
    %c0 = arith.constant 0 : index
    %c0_0 = arith.constant 0 : index
    %0 = vector.load %arg0[%c0, %c0_0] : memref<16x32xf32, #tpu.memory_space<vmem>>, vector<16x32xf32>
    %c0_1 = arith.constant 0 : index
    %c0_2 = arith.constant 0 : index
    %1 = vector.load %arg1[%c0_1, %c0_2] : memref<8x128xf32, #tpu.memory_space<vmem>>, vector<8x128xf32>
    %c0_3 = arith.constant 0 : index
    %c0_4 = arith.constant 0 : index
    %2 = vector.load %arg2[%c0_3, %c0_4] : memref<32x256xf32, #tpu.memory_space<vmem>>, vector<32x256xf32>
    %c0_5 = arith.constant 0 : index
    %c0_6 = arith.constant 0 : index
    %3 = vector.load %arg3[%c0_5, %c0_6] : memref<128x32xf32, #tpu.memory_space<vmem>>, vector<128x32xf32>
    %4 = vector.extract_strided_slice %1 {offsets = [0, 0], sizes = [1, 32], strides = [1, 1]} : vector<8x128xf32> to vector<1x32xf32>
    %5 = vector.extract_strided_slice %1 {offsets = [1, 0], sizes = [1, 32], strides = [1, 1]} : vector<8x128xf32> to vector<1x32xf32>
    %6 = vector.extract_strided_slice %1 {offsets = [2, 0], sizes = [1, 96], strides = [1, 1]} : vector<8x128xf32> to vector<1x96xf32>
    %7 = vector.extract_strided_slice %1 {offsets = [3, 0], sizes = [1, 32], strides = [1, 1]} : vector<8x128xf32> to vector<1x32xf32>
    %8 = vector.extract_strided_slice %1 {offsets = [4, 0], sizes = [1, 32], strides = [1, 1]} : vector<8x128xf32> to vector<1x32xf32>
    %9 = vector.extract_strided_slice %1 {offsets = [5, 0], sizes = [1, 32], strides = [1, 1]} : vector<8x128xf32> to vector<1x32xf32>
    %10 = vector.extract_strided_slice %1 {offsets = [6, 0], sizes = [1, 128], strides = [1, 1]} : vector<8x128xf32> to vector<1x128xf32>
    %11 = vector.extract_strided_slice %1 {offsets = [7, 0], sizes = [1, 32], strides = [1, 1]} : vector<8x128xf32> to vector<1x32xf32>
    %12 = vector.extract_strided_slice %2 {offsets = [0, 0], sizes = [32, 96], strides = [1, 1]} : vector<32x256xf32> to vector<32x96xf32>
    %13 = vector.extract_strided_slice %2 {offsets = [0, 96], sizes = [32, 32], strides = [1, 1]} : vector<32x256xf32> to vector<32x32xf32>
    %14 = vector.extract_strided_slice %2 {offsets = [0, 128], sizes = [32, 128], strides = [1, 1]} : vector<32x256xf32> to vector<32x128xf32>
    %cst = arith.constant dense<0.000000e+00> : vector<16xf32>
    %15 = vector.multi_reduction <add>, %0, %cst [1] : vector<16x32xf32> to vector<16xf32>
    %16 = vector.shape_cast %15 : vector<16xf32> to vector<16x1xf32>
    %cst_7 = arith.constant 3.200000e+01 : f32
    %17 = vector.broadcast %cst_7 : f32 to vector<16x1xf32>
    %18 = arith.divf %16, %17 : vector<16x1xf32>
    %19 = vector.broadcast %18 : vector<16x1xf32> to vector<16x32xf32>
    %20 = arith.subf %0, %19 : vector<16x32xf32>
    %21 = arith.mulf %20, %20 : vector<16x32xf32>
    %cst_8 = arith.constant dense<0.000000e+00> : vector<16xf32>
    %22 = vector.multi_reduction <add>, %21, %cst_8 [1] : vector<16x32xf32> to vector<16xf32>
    %23 = vector.shape_cast %22 : vector<16xf32> to vector<16x1xf32>
    %cst_9 = arith.constant 3.200000e+01 : f32
    %24 = vector.broadcast %cst_9 : f32 to vector<16x1xf32>
    %25 = arith.divf %23, %24 : vector<16x1xf32>
    %26 = vector.broadcast %18 : vector<16x1xf32> to vector<16x32xf32>
    %27 = arith.subf %0, %26 : vector<16x32xf32>
    %cst_10 = arith.constant 9.99999974E-6 : f32
    %28 = vector.broadcast %cst_10 : f32 to vector<16x1xf32>
    %29 = arith.addf %25, %28 : vector<16x1xf32>
    %30 = math.rsqrt %29 : vector<16x1xf32>
    %31 = vector.broadcast %30 : vector<16x1xf32> to vector<16x32xf32>
    %32 = arith.mulf %27, %31 : vector<16x32xf32>
    %33 = vector.broadcast %4 : vector<1x32xf32> to vector<16x32xf32>
    %34 = arith.mulf %32, %33 : vector<16x32xf32>
    %35 = vector.broadcast %5 : vector<1x32xf32> to vector<16x32xf32>
    %36 = arith.addf %34, %35 : vector<16x32xf32>
    %cst_11 = arith.constant dense<0.000000e+00> : vector<16x96xf32>
    %37 = tpu.matmul %36, %12, %cst_11 {dimension_numbers = #tpu.dot_dimension_numbers<[1], [0], [0], [1], [0, 0, 1, 1], [], []>} : vector<16x32xf32>, vector<32x96xf32>, vector<16x96xf32> -> vector<16x96xf32>
    %38 = vector.broadcast %6 : vector<1x96xf32> to vector<16x96xf32>
    %39 = arith.addf %37, %38 : vector<16x96xf32>
    %40 = vector.shape_cast %39 : vector<16x96xf32> to vector<2x8x96xf32>
    %41 = tpu.iota {dimensions = array<i32: 0>} : vector<8x8xi32>
    %42 = tpu.iota {dimensions = array<i32: 1>} : vector<8x8xi32>
    %43 = arith.cmpi sgt, %42, %41 : vector<8x8xi32>
    %cst_12 = arith.constant -1.000000e+30 : f32
    %cst_13 = arith.constant 0.000000e+00 : f32
    %44 = vector.broadcast %cst_12 : f32 to vector<8x8xf32>
    %45 = vector.broadcast %cst_13 : f32 to vector<8x8xf32>
    %46 = arith.select %43, %44, %45 : vector<8x8xi1>, vector<8x8xf32>
    %cst_14 = arith.constant 0.000000e+00 : f32
    %47 = vector.broadcast %cst_14 : f32 to vector<16x32xf32>
    %48 = vector.extract_strided_slice %40 {offsets = [0, 0, 0], sizes = [2, 8, 8], strides = [1, 1, 1]} : vector<2x8x96xf32> to vector<2x8x8xf32>
    %49 = vector.extract_strided_slice %40 {offsets = [0, 0, 32], sizes = [2, 8, 8], strides = [1, 1, 1]} : vector<2x8x96xf32> to vector<2x8x8xf32>
    %50 = vector.extract_strided_slice %40 {offsets = [0, 0, 64], sizes = [2, 8, 8], strides = [1, 1, 1]} : vector<2x8x96xf32> to vector<2x8x8xf32>
    "tpu.trace_start"() <{level = 10 : i32, message = "nsd,ntd->nst"}> : () -> ()
    %cst_15 = arith.constant dense<0.000000e+00> : vector<2x8x8xf32>
    %51 = tpu.matmul %48, %49, %cst_15 {dimension_numbers = #tpu.dot_dimension_numbers<[2], [2], [1], [1], [0, 0, 0, 1, 1, 1], [0], [0]>} : vector<2x8x8xf32>, vector<2x8x8xf32>, vector<2x8x8xf32> -> vector<2x8x8xf32>
    "tpu.trace_stop"() : () -> ()
    %52 = vector.shape_cast %46 : vector<8x8xf32> to vector<1x8x8xf32>
    %53 = vector.broadcast %52 : vector<1x8x8xf32> to vector<2x8x8xf32>
    %54 = arith.addf %51, %53 : vector<2x8x8xf32>
    %cst_16 = arith.constant dense<0xFF800000> : vector<2x8xf32>
    %55 = vector.multi_reduction <maximumf>, %54, %cst_16 [2] : vector<2x8x8xf32> to vector<2x8xf32>
    %56 = vector.shape_cast %55 : vector<2x8xf32> to vector<2x8x1xf32>
    %57 = vector.broadcast %56 : vector<2x8x1xf32> to vector<2x8x8xf32>
    %58 = arith.subf %54, %57 : vector<2x8x8xf32>
    %59 = math.exp %58 : vector<2x8x8xf32>
    %cst_17 = arith.constant dense<0.000000e+00> : vector<2x8xf32>
    %60 = vector.multi_reduction <add>, %59, %cst_17 [2] : vector<2x8x8xf32> to vector<2x8xf32>
    %61 = vector.shape_cast %60 : vector<2x8xf32> to vector<2x8x1xf32>
    %62 = vector.broadcast %61 : vector<2x8x1xf32> to vector<2x8x8xf32>
    %63 = arith.divf %59, %62 : vector<2x8x8xf32>
    "tpu.trace_start"() <{level = 10 : i32, message = "nst,ntd->nsd"}> : () -> ()
    %cst_18 = arith.constant dense<0.000000e+00> : vector<2x8x8xf32>
    %64 = tpu.matmul %63, %50, %cst_18 {dimension_numbers = #tpu.dot_dimension_numbers<[2], [1], [1], [2], [0, 0, 0, 1, 1, 2], [0], [0]>} : vector<2x8x8xf32>, vector<2x8x8xf32>, vector<2x8x8xf32> -> vector<2x8x8xf32>
    "tpu.trace_stop"() : () -> ()
    %65 = vector.shape_cast %64 : vector<2x8x8xf32> to vector<16x8xf32>
    %66 = vector.extract_strided_slice %13 {offsets = [0, 0], sizes = [8, 32], strides = [1, 1]} : vector<32x32xf32> to vector<8x32xf32>
    %cst_19 = arith.constant dense<0.000000e+00> : vector<16x32xf32>
    %67 = tpu.matmul %65, %66, %cst_19 {dimension_numbers = #tpu.dot_dimension_numbers<[1], [0], [0], [1], [0, 0, 1, 1], [], []>} : vector<16x8xf32>, vector<8x32xf32>, vector<16x32xf32> -> vector<16x32xf32>
    %68 = arith.addf %47, %67 : vector<16x32xf32>
    %69 = vector.extract_strided_slice %40 {offsets = [0, 0, 8], sizes = [2, 8, 8], strides = [1, 1, 1]} : vector<2x8x96xf32> to vector<2x8x8xf32>
    %70 = vector.extract_strided_slice %40 {offsets = [0, 0, 40], sizes = [2, 8, 8], strides = [1, 1, 1]} : vector<2x8x96xf32> to vector<2x8x8xf32>
    %71 = vector.extract_strided_slice %40 {offsets = [0, 0, 72], sizes = [2, 8, 8], strides = [1, 1, 1]} : vector<2x8x96xf32> to vector<2x8x8xf32>
    "tpu.trace_start"() <{level = 10 : i32, message = "nsd,ntd->nst"}> : () -> ()
    %cst_20 = arith.constant dense<0.000000e+00> : vector<2x8x8xf32>
    %72 = tpu.matmul %69, %70, %cst_20 {dimension_numbers = #tpu.dot_dimension_numbers<[2], [2], [1], [1], [0, 0, 0, 1, 1, 1], [0], [0]>} : vector<2x8x8xf32>, vector<2x8x8xf32>, vector<2x8x8xf32> -> vector<2x8x8xf32>
    "tpu.trace_stop"() : () -> ()
    %73 = vector.shape_cast %46 : vector<8x8xf32> to vector<1x8x8xf32>
    %74 = vector.broadcast %73 : vector<1x8x8xf32> to vector<2x8x8xf32>
    %75 = arith.addf %72, %74 : vector<2x8x8xf32>
    %cst_21 = arith.constant dense<0xFF800000> : vector<2x8xf32>
    %76 = vector.multi_reduction <maximumf>, %75, %cst_21 [2] : vector<2x8x8xf32> to vector<2x8xf32>
    %77 = vector.shape_cast %76 : vector<2x8xf32> to vector<2x8x1xf32>
    %78 = vector.broadcast %77 : vector<2x8x1xf32> to vector<2x8x8xf32>
    %79 = arith.subf %75, %78 : vector<2x8x8xf32>
    %80 = math.exp %79 : vector<2x8x8xf32>
    %cst_22 = arith.constant dense<0.000000e+00> : vector<2x8xf32>
    %81 = vector.multi_reduction <add>, %80, %cst_22 [2] : vector<2x8x8xf32> to vector<2x8xf32>
    %82 = vector.shape_cast %81 : vector<2x8xf32> to vector<2x8x1xf32>
    %83 = vector.broadcast %82 : vector<2x8x1xf32> to vector<2x8x8xf32>
    %84 = arith.divf %80, %83 : vector<2x8x8xf32>
    "tpu.trace_start"() <{level = 10 : i32, message = "nst,ntd->nsd"}> : () -> ()
    %cst_23 = arith.constant dense<0.000000e+00> : vector<2x8x8xf32>
    %85 = tpu.matmul %84, %71, %cst_23 {dimension_numbers = #tpu.dot_dimension_numbers<[2], [1], [1], [2], [0, 0, 0, 1, 1, 2], [0], [0]>} : vector<2x8x8xf32>, vector<2x8x8xf32>, vector<2x8x8xf32> -> vector<2x8x8xf32>
    "tpu.trace_stop"() : () -> ()
    %86 = vector.shape_cast %85 : vector<2x8x8xf32> to vector<16x8xf32>
    %87 = vector.extract_strided_slice %13 {offsets = [8, 0], sizes = [8, 32], strides = [1, 1]} : vector<32x32xf32> to vector<8x32xf32>
    %cst_24 = arith.constant dense<0.000000e+00> : vector<16x32xf32>
    %88 = tpu.matmul %86, %87, %cst_24 {dimension_numbers = #tpu.dot_dimension_numbers<[1], [0], [0], [1], [0, 0, 1, 1], [], []>} : vector<16x8xf32>, vector<8x32xf32>, vector<16x32xf32> -> vector<16x32xf32>
    %89 = arith.addf %68, %88 : vector<16x32xf32>
    %90 = vector.extract_strided_slice %40 {offsets = [0, 0, 16], sizes = [2, 8, 8], strides = [1, 1, 1]} : vector<2x8x96xf32> to vector<2x8x8xf32>
    %91 = vector.extract_strided_slice %40 {offsets = [0, 0, 48], sizes = [2, 8, 8], strides = [1, 1, 1]} : vector<2x8x96xf32> to vector<2x8x8xf32>
    %92 = vector.extract_strided_slice %40 {offsets = [0, 0, 80], sizes = [2, 8, 8], strides = [1, 1, 1]} : vector<2x8x96xf32> to vector<2x8x8xf32>
    "tpu.trace_start"() <{level = 10 : i32, message = "nsd,ntd->nst"}> : () -> ()
    %cst_25 = arith.constant dense<0.000000e+00> : vector<2x8x8xf32>
    %93 = tpu.matmul %90, %91, %cst_25 {dimension_numbers = #tpu.dot_dimension_numbers<[2], [2], [1], [1], [0, 0, 0, 1, 1, 1], [0], [0]>} : vector<2x8x8xf32>, vector<2x8x8xf32>, vector<2x8x8xf32> -> vector<2x8x8xf32>
    "tpu.trace_stop"() : () -> ()
    %94 = vector.shape_cast %46 : vector<8x8xf32> to vector<1x8x8xf32>
    %95 = vector.broadcast %94 : vector<1x8x8xf32> to vector<2x8x8xf32>
    %96 = arith.addf %93, %95 : vector<2x8x8xf32>
    %cst_26 = arith.constant dense<0xFF800000> : vector<2x8xf32>
    %97 = vector.multi_reduction <maximumf>, %96, %cst_26 [2] : vector<2x8x8xf32> to vector<2x8xf32>
    %98 = vector.shape_cast %97 : vector<2x8xf32> to vector<2x8x1xf32>
    %99 = vector.broadcast %98 : vector<2x8x1xf32> to vector<2x8x8xf32>
    %100 = arith.subf %96, %99 : vector<2x8x8xf32>
    %101 = math.exp %100 : vector<2x8x8xf32>
    %cst_27 = arith.constant dense<0.000000e+00> : vector<2x8xf32>
    %102 = vector.multi_reduction <add>, %101, %cst_27 [2] : vector<2x8x8xf32> to vector<2x8xf32>
    %103 = vector.shape_cast %102 : vector<2x8xf32> to vector<2x8x1xf32>
    %104 = vector.broadcast %103 : vector<2x8x1xf32> to vector<2x8x8xf32>
    %105 = arith.divf %101, %104 : vector<2x8x8xf32>
    "tpu.trace_start"() <{level = 10 : i32, message = "nst,ntd->nsd"}> : () -> ()
    %cst_28 = arith.constant dense<0.000000e+00> : vector<2x8x8xf32>
    %106 = tpu.matmul %105, %92, %cst_28 {dimension_numbers = #tpu.dot_dimension_numbers<[2], [1], [1], [2], [0, 0, 0, 1, 1, 2], [0], [0]>} : vector<2x8x8xf32>, vector<2x8x8xf32>, vector<2x8x8xf32> -> vector<2x8x8xf32>
    "tpu.trace_stop"() : () -> ()
    %107 = vector.shape_cast %106 : vector<2x8x8xf32> to vector<16x8xf32>
    %108 = vector.extract_strided_slice %13 {offsets = [16, 0], sizes = [8, 32], strides = [1, 1]} : vector<32x32xf32> to vector<8x32xf32>
    %cst_29 = arith.constant dense<0.000000e+00> : vector<16x32xf32>
    %109 = tpu.matmul %107, %108, %cst_29 {dimension_numbers = #tpu.dot_dimension_numbers<[1], [0], [0], [1], [0, 0, 1, 1], [], []>} : vector<16x8xf32>, vector<8x32xf32>, vector<16x32xf32> -> vector<16x32xf32>
    %110 = arith.addf %89, %109 : vector<16x32xf32>
    %111 = vector.extract_strided_slice %40 {offsets = [0, 0, 24], sizes = [2, 8, 8], strides = [1, 1, 1]} : vector<2x8x96xf32> to vector<2x8x8xf32>
    %112 = vector.extract_strided_slice %40 {offsets = [0, 0, 56], sizes = [2, 8, 8], strides = [1, 1, 1]} : vector<2x8x96xf32> to vector<2x8x8xf32>
    %113 = vector.extract_strided_slice %40 {offsets = [0, 0, 88], sizes = [2, 8, 8], strides = [1, 1, 1]} : vector<2x8x96xf32> to vector<2x8x8xf32>
    "tpu.trace_start"() <{level = 10 : i32, message = "nsd,ntd->nst"}> : () -> ()
    %cst_30 = arith.constant dense<0.000000e+00> : vector<2x8x8xf32>
    %114 = tpu.matmul %111, %112, %cst_30 {dimension_numbers = #tpu.dot_dimension_numbers<[2], [2], [1], [1], [0, 0, 0, 1, 1, 1], [0], [0]>} : vector<2x8x8xf32>, vector<2x8x8xf32>, vector<2x8x8xf32> -> vector<2x8x8xf32>
    "tpu.trace_stop"() : () -> ()
    %115 = vector.shape_cast %46 : vector<8x8xf32> to vector<1x8x8xf32>
    %116 = vector.broadcast %115 : vector<1x8x8xf32> to vector<2x8x8xf32>
    %117 = arith.addf %114, %116 : vector<2x8x8xf32>
    %cst_31 = arith.constant dense<0xFF800000> : vector<2x8xf32>
    %118 = vector.multi_reduction <maximumf>, %117, %cst_31 [2] : vector<2x8x8xf32> to vector<2x8xf32>
    %119 = vector.shape_cast %118 : vector<2x8xf32> to vector<2x8x1xf32>
    %120 = vector.broadcast %119 : vector<2x8x1xf32> to vector<2x8x8xf32>
    %121 = arith.subf %117, %120 : vector<2x8x8xf32>
    %122 = math.exp %121 : vector<2x8x8xf32>
    %cst_32 = arith.constant dense<0.000000e+00> : vector<2x8xf32>
    %123 = vector.multi_reduction <add>, %122, %cst_32 [2] : vector<2x8x8xf32> to vector<2x8xf32>
    %124 = vector.shape_cast %123 : vector<2x8xf32> to vector<2x8x1xf32>
    %125 = vector.broadcast %124 : vector<2x8x1xf32> to vector<2x8x8xf32>
    %126 = arith.divf %122, %125 : vector<2x8x8xf32>
    "tpu.trace_start"() <{level = 10 : i32, message = "nst,ntd->nsd"}> : () -> ()
    %cst_33 = arith.constant dense<0.000000e+00> : vector<2x8x8xf32>
    %127 = tpu.matmul %126, %113, %cst_33 {dimension_numbers = #tpu.dot_dimension_numbers<[2], [1], [1], [2], [0, 0, 0, 1, 1, 2], [0], [0]>} : vector<2x8x8xf32>, vector<2x8x8xf32>, vector<2x8x8xf32> -> vector<2x8x8xf32>
    "tpu.trace_stop"() : () -> ()
    %128 = vector.shape_cast %127 : vector<2x8x8xf32> to vector<16x8xf32>
    %129 = vector.extract_strided_slice %13 {offsets = [24, 0], sizes = [8, 32], strides = [1, 1]} : vector<32x32xf32> to vector<8x32xf32>
    %cst_34 = arith.constant dense<0.000000e+00> : vector<16x32xf32>
    %130 = tpu.matmul %128, %129, %cst_34 {dimension_numbers = #tpu.dot_dimension_numbers<[1], [0], [0], [1], [0, 0, 1, 1], [], []>} : vector<16x8xf32>, vector<8x32xf32>, vector<16x32xf32> -> vector<16x32xf32>
    %131 = arith.addf %110, %130 : vector<16x32xf32>
    %132 = vector.broadcast %7 : vector<1x32xf32> to vector<16x32xf32>
    %133 = arith.addf %131, %132 : vector<16x32xf32>
    %134 = arith.addf %36, %133 : vector<16x32xf32>
    %cst_35 = arith.constant dense<0.000000e+00> : vector<16xf32>
    %135 = vector.multi_reduction <add>, %134, %cst_35 [1] : vector<16x32xf32> to vector<16xf32>
    %136 = vector.shape_cast %135 : vector<16xf32> to vector<16x1xf32>
    %cst_36 = arith.constant 3.200000e+01 : f32
    %137 = vector.broadcast %cst_36 : f32 to vector<16x1xf32>
    %138 = arith.divf %136, %137 : vector<16x1xf32>
    %139 = vector.broadcast %138 : vector<16x1xf32> to vector<16x32xf32>
    %140 = arith.subf %134, %139 : vector<16x32xf32>
    %141 = arith.mulf %140, %140 : vector<16x32xf32>
    %cst_37 = arith.constant dense<0.000000e+00> : vector<16xf32>
    %142 = vector.multi_reduction <add>, %141, %cst_37 [1] : vector<16x32xf32> to vector<16xf32>
    %143 = vector.shape_cast %142 : vector<16xf32> to vector<16x1xf32>
    %cst_38 = arith.constant 3.200000e+01 : f32
    %144 = vector.broadcast %cst_38 : f32 to vector<16x1xf32>
    %145 = arith.divf %143, %144 : vector<16x1xf32>
    %146 = vector.broadcast %138 : vector<16x1xf32> to vector<16x32xf32>
    %147 = arith.subf %134, %146 : vector<16x32xf32>
    %cst_39 = arith.constant 9.99999974E-6 : f32
    %148 = vector.broadcast %cst_39 : f32 to vector<16x1xf32>
    %149 = arith.addf %145, %148 : vector<16x1xf32>
    %150 = math.rsqrt %149 : vector<16x1xf32>
    %151 = vector.broadcast %150 : vector<16x1xf32> to vector<16x32xf32>
    %152 = arith.mulf %147, %151 : vector<16x32xf32>
    %153 = vector.broadcast %8 : vector<1x32xf32> to vector<16x32xf32>
    %154 = arith.mulf %152, %153 : vector<16x32xf32>
    %155 = vector.broadcast %9 : vector<1x32xf32> to vector<16x32xf32>
    %156 = arith.addf %154, %155 : vector<16x32xf32>
    %cst_40 = arith.constant dense<0.000000e+00> : vector<16x128xf32>
    %157 = tpu.matmul %156, %14, %cst_40 {dimension_numbers = #tpu.dot_dimension_numbers<[1], [0], [0], [1], [0, 0, 1, 1], [], []>} : vector<16x32xf32>, vector<32x128xf32>, vector<16x128xf32> -> vector<16x128xf32>
    %158 = vector.broadcast %10 : vector<1x128xf32> to vector<16x128xf32>
    %159 = arith.addf %157, %158 : vector<16x128xf32>
    %cst_41 = arith.constant 5.000000e-01 : f32
    %160 = vector.broadcast %cst_41 : f32 to vector<16x128xf32>
    %161 = arith.mulf %160, %159 : vector<16x128xf32>
    %cst_42 = arith.constant 0.707106769 : f32
    %162 = vector.broadcast %cst_42 : f32 to vector<16x128xf32>
    %163 = arith.mulf %159, %162 : vector<16x128xf32>
    %164 = math.erf %163 : vector<16x128xf32>
    %cst_43 = arith.constant 1.000000e+00 : f32
    %165 = vector.broadcast %cst_43 : f32 to vector<16x128xf32>
    %166 = arith.addf %165, %164 : vector<16x128xf32>
    %167 = arith.mulf %161, %166 : vector<16x128xf32>
    %cst_44 = arith.constant dense<0.000000e+00> : vector<16x32xf32>
    %168 = tpu.matmul %167, %3, %cst_44 {dimension_numbers = #tpu.dot_dimension_numbers<[1], [0], [0], [1], [0, 0, 1, 1], [], []>} : vector<16x128xf32>, vector<128x32xf32>, vector<16x32xf32> -> vector<16x32xf32>
    %169 = vector.broadcast %11 : vector<1x32xf32> to vector<16x32xf32>
    %170 = arith.addf %168, %169 : vector<16x32xf32>
    %171 = arith.addf %134, %170 : vector<16x32xf32>
    %c0_45 = arith.constant 0 : index
    %c0_46 = arith.constant 0 : index
    %172 = vector.load %arg4[%c0_45, %c0_46] : memref<16x32xf32, #tpu.memory_space<vmem>>, vector<16x32xf32>
    tpu.vector_store %arg4[%c0_45, %c0_46], %171 {strides = array<i32>} : memref<16x32xf32, #tpu.memory_space<vmem>>, vector<16x32xf32>,
    return
  }
}

</mosaic_0001>

<bundles_post_ra>
// kernel: tpu_custom_call.1
= control target key start
LH: loop header
LB: loop body
LE: loop exit
PB: predicated region body
PF: predicated region fallthrough
CT: control target
= control target key end

     0   :  { %vm45_vm0 = vcmask 261120   ;;  %s2842_s0 = inlined_call_operand.vmem [shape: f32[16,32], index: 0, kind: input, shape index: {}]   ;;  %s2843_s1 = inlined_call_operand.vmem [shape: f32[8,128], index: 1, kind: input, shape index: {}]   ;;  %s2844_s2 = inlined_call_operand.vmem [shape: f32[32,256], index: 2, kind: input, shape index: {}]   ;;  %s2845_s3 = inlined_call_operand.vmem [shape: f32[128,32], index: 3, kind: input, shape index: {}]   ;;  %s2846_s4 = inlined_call_operand.hbm [shape: f32[16,32], index: 4, kind: output, shape index: {}]  }
   0x1   :  { %v18_v0 = vld [vmem:[%s2842_s0] sm:$0xff]  ;;  %v19_v1 = vld [vmem:[%s2842_s0 + $0x8] sm:$0xff] }
   0x2   :  { %9 = vsyncpa [#allocation3], 0  ;;  %v46_v2 = vsel %vm45_vm0, %v18_v0, 0.0  ;;  %v49_v3 = vsel %vm45_vm0, %v19_v1, 0.0  ;;  %v2540_v14 = vld [vmem:[%s2844_s2] sm:$0xff]  ;;  %v2545_v15 = vld [vmem:[%s2844_s2 + $0x10] sm:$0xff]  ;;  %v73_v22 = vlaneseq }
   0x3   :  { %47 = vadd.xlane.f32.xlu0 %v46_v2  ;;  %v2550_v16 = vld [vmem:[%s2844_s2 + $0x20] sm:$0xff]  ;;  %v2346_v17 = vpack.c.bf16 %v2545_v15, %v2540_v14  ;;  %v2557_v18 = vld [vmem:[%s2844_s2 + $0x30] sm:$0xff]  ;;  %v2485_v41 = vmov 0.0   ;;  %vm2486_vm1 = vmmov 0   ;;  %vm179_vm2 = vcmask 64512   ;;  %s2488_s28 = smov 64  }
   0x4   :  { %v2350_v19 = vpack.c.bf16 %v2557_v18, %v2550_v16  ;;  %v2561_v26 = vshrl.u32 %v73_v22, 7  ;;  %v2567_v29 = vld [vmem:[%s2843_s1] sm:$0xff]  ;;  %2230 = vmatprep.subr.mxu0 %v2485_v41  ;;  %2232 = vmatprep.mubr.msk.f32.mxu0 %vm2486_vm1, %v2485_v41  ;;  %s2487_s1 = smov 96   ;;  %v173_v50 = vand.u32 127, %v73_v22  ;;  %s2489_s29 = smov 88  }
   0x5   :  { %2347 = vmatprep.subr.bf16.mxu1 %v2346_v17  ;;  %s2490_s30 = smov 120   ;;  %s2491_s5 = smov 80  }
   0x6   :  { %2349 = vmatpush3.bf16.msra.mxu1 %v2346_v17  ;;  %v75_v28 = vsub.s32 0, %v2561_v26  ;;  %v81_v30 = vsub.s32 1, %v2561_v26  ;;  %v87_v42 = vsub.s32 2, %v2561_v26  ;;  %vm174_vm3 = vcmp.gt.s32.totalorder %v173_v50, %v2561_v26  ;;  %s2492_s6 = smov 56   ;;  %s2493_s7 = smov 112  }
   0x7   :  { %50 = vadd.xlane.f32.xlu0 %v49_v3  ;;  %2351 = vmatprep.subr.bf16.mxu1 %v2350_v19  ;;  %v2608_v51 = vsel %vm174_vm3, -1e+30, %v2485_v41  ;;  %s2494_s8 = smov 32   ;;  %s2495_s9 = smov 48  }
   0x8   :  { %v76_v31 = vrot.slane %v2567_v29, %v75_v28  ;;  %v82_v34 = vrot.slane %v2567_v29, %v81_v30  ;;  %v88_v43 = vrot.slane %v2567_v29, %v87_v42  ;;  %s2496_s10 = smov 72   ;;  %s2497_s11 = smov 104  }
   0x9   :  { %s2498_s12 = smov 40  }
   0xa   :  { %2353 = vmatpush3.bf16.msra.mxu1 %v2350_v19 }
   0xb   :  { %2200 = vmatprep.subr.mxu1 %v2485_v41 }
  0x90   :  { %v48_v4 = vpop.xlane.xlu0 %47 }
  0x91   :  { %v53_v5 = vmul.f32 0.03125, %v48_v4 }
  0x93   :  { %v55_v6 = vsub.f32 %v18_v0, %v53_v5 }
  0x94   :  { %v51_v7 = vpop.xlane.xlu0 %50 }
  0x95   :  { %v54_v8 = vmul.f32 0.03125, %v51_v7  ;;  %v57_v9 = vmul.f32 %v55_v6, %v55_v6 }
  0x97   :  { %v56_v10 = vsub.f32 %v19_v1, %v54_v8  ;;  %v59_v11 = vsel %vm45_vm0, %v57_v9, 0.0 }
  0x98   :  { %60 = vadd.xlane.f32.xlu1 %v59_v11 }
  0x99   :  { %v58_v12 = vmul.f32 %v56_v10, %v56_v10 }
  0x9b   :  { %v62_v13 = vsel %vm45_vm0, %v58_v12, 0.0 }
  0x9c   :  { %63 = vadd.xlane.f32.xlu1 %v62_v13 }
 0x125   :  { %v61_v20 = vpop.xlane.xlu1 %60 }
 0x126   :  { %v65_v21 = vmul.f32 0.03125, %v61_v20 }
 0x128   :  { %v67_v23 = vadd.f32 1e-05, %v65_v21 }
 0x129   :  { %v64_v24 = vpop.xlane.xlu1 %63 }
 0x12a   :  { %2417 = vrsqrt.f32 %v67_v23  ;;  %v66_v25 = vmul.f32 0.03125, %v64_v24 }
 0x12c   :  { %v68_v27 = vadd.f32 1e-05, %v66_v25 }
 0x12e   :  { %2419 = vrsqrt.f32 %v68_v27 }
 0x134   :  { %v2418_v32 = vpop.eup %2417 }
 0x135   :  { %v71_v33 = vmul.f32 %v2418_v32, %v55_v6 }
 0x137   :  { %v77_v35 = vmul.f32 %v76_v31, %v71_v33 }
 0x138   :  { %v2420_v36 = vpop.eup %2419 }
 0x139   :  { %v72_v37 = vmul.f32 %v2420_v36, %v56_v10  ;;  %v2572_v38 = vadd.f32 %v82_v34, %v77_v35 }
 0x13b   :  { %v78_v39 = vmul.f32 %v76_v31, %v72_v37  ;;  %2197 = vmatprep.mubr.msk.f32.mxu1 %vm45_vm0, %v2572_v38 }
 0x13d   :  { %v2576_v40 = vadd.f32 %v82_v34, %v78_v39 }
 0x13f   :  { %2198 = vmatmul.mubr.msk.f32.vlgmr.msra.gmra.mrb[0].mxu1 %vm45_vm0, %v2576_v40 }
 0x140   :  { %2202 = vmatprep.mubr.msk.f32.mxu1 %vm2486_vm1, %v2485_v41 }
 0x212   :  { %v2199_v44 = vpop.f32.mrb[0].mxu1 }
 0x213   :  { %v2588_v45 = vadd.f32 %v2199_v44, %v88_v43  ;;  %v161_v46 = vpop.f32.mrb[1].mxu1 }
 0x214   :  { %v2590_v47 = vadd.f32 %v161_v46, %v88_v43 }
 0x215   :  { %255 = vrot.lane.b32.xlu1 %v2588_v45, %s2487_s1 }
 0x216   :  { %177 = vrot.lane.b32.xlu0 %v2590_v47, %s2487_s1 }
 0x287   :  { %v256_v49 = vpop.permute.xlu1 %255 }
 0x288   :  { %v178_v48 = vpop.permute.xlu0 %177 }
 0x289   :  { %2201 = vmatpush3.xpose.msk.msra.mxu1 %vm179_vm2, %v178_v48 }
 0x28a   :  { %2205 = vmatprep.subr.mxu1 %v2485_v41 }
 0x28c   :  { %2203 = vmatmul.mubr.msk.f32.vlgmr.msra.gmra.mrb[2].mxu1 %vm179_vm2, %v2590_v47 }
 0x28d   :  { %2206 = vmatpush3.xpose.msk.msra.mxu1 %vm179_vm2, %v256_v49  ;;  %2207 = vmatprep.mubr.msk.f32.mxu1 %vm2486_vm1, %v2485_v41 }
 0x28e   :  { %2210 = vmatprep.subr.mxu1 %v2485_v41 }
 0x290   :  { %2208 = vmatmul.mubr.msk.f32.vlgmr.msra.gmra.mrb[4].mxu1 %vm179_vm2, %v2588_v45 }
 0x291   :  { %2212 = vmatprep.mubr.msk.f32.mxu1 %vm2486_vm1, %v2485_v41 }
 0x35f   :  { %v250_v52 = vpop.f32.mrb[2].mxu1 }
 0x360   :  { %v251_v53 = vadd.f32 %v250_v52, %v2608_v51  ;;  %v2204_v54 = vpop.f32.mrb[3].mxu1 }
 0x362   :  { %v331_v55 = vsel %vm179_vm2, %v251_v53, -inf }
 0x363   :  { %332 = vmax.xlane.f32.xlu1 %v331_v55  ;;  %v327_v56 = vpop.f32.mrb[4].mxu1 }
 0x364   :  { %v328_v57 = vadd.f32 %v327_v56, %v2608_v51  ;;  %v2209_v58 = vpop.f32.mrb[5].mxu1 }
 0x366   :  { %v334_v59 = vsel %vm179_vm2, %v328_v57, -inf }
 0x367   :  { %335 = vmax.xlane.f32.xlu0 %v334_v59 }
 0x374   :  { %429 = vrot.lane.b32.xlu1 %v2588_v45, %s2488_s28 }
 0x378   :  { %507 = vrot.lane.b32.xlu1 %v2590_v47, %s2489_s29 }
 0x37c   :  { %505 = vrot.lane.b32.xlu1 %v2590_v47, %s2490_s30 }
 0x3f0   :  { %v333_v60 = vpop.xlane.xlu1 %332 }
 0x3f1   :  { %v337_v61 = vsub.f32 %v251_v53, %v333_v60 }
 0x3f3   :  { %v339_v62 = vmul.f32 1.442695, %v337_v61 }
 0x3f4   :  { %v336_v63 = vpop.xlane.xlu0 %335  ;;  %v430_v6 = vpop.permute.xlu1 %429 }
 0x3f5   :  { %2421 = vpow2.f32 %v339_v62  ;;  %v338_v0 = vsub.f32 %v328_v57, %v336_v63 }
 0x3f7   :  { %v341_v1 = vmul.f32 1.442695, %v338_v0 }
 0x3f8   :  { %v508_v7 = vpop.permute.xlu1 %507 }
 0x3f9   :  { %2423 = vpow2.f32 %v341_v1 }
 0x3fc   :  { %v506_v8 = vpop.permute.xlu1 %505 }
 0x3ff   :  { %v2422_v2 = vpop.eup %2421 }
 0x400   :  { %v343_v3 = vsel %vm179_vm2, %v2422_v2, 0.0 }
 0x401   :  { %344 = vadd.xlane.f32.xlu0 %v343_v3 }
 0x403   :  { %v2424_v4 = vpop.eup %2423 }
 0x404   :  { %v346_v5 = vsel %vm179_vm2, %v2424_v4, 0.0 }
 0x405   :  { %347 = vadd.xlane.f32.xlu1 %v346_v5 }
 0x416   :  { %583 = vrot.lane.b32.xlu1 %v2588_v45, %s2490_s30 }
 0x417   :  { %353 = vrot.lane.b32.xlu0 %v2590_v47, %s2488_s28 }
 0x41a   :  { %1007 = vrot.lane.b32.xlu1 %v2590_v47, %s2491_s5 }
 0x41b   :  { %585 = vrot.lane.b32.xlu0 %v2588_v45, %s2489_s29 }
 0x48e   :  { %v345_v9 = vpop.xlane.xlu0 %344 }
 0x48f   :  { %2425 = vrcp.f32 %v345_v9 }
 0x492   :  { %v348_v10 = vpop.xlane.xlu1 %347  ;;  %v354_v11 = vpop.permute.xlu0 %353 }
 0x493   :  { %2427 = vrcp.f32 %v348_v10  ;;  %2211 = vmatpush3.msra.mxu1 %v354_v11 }
 0x494   :  { %2215 = vmatprep.subr.mxu1 %v2485_v41 }
 0x496   :  { %v586_v20 = vpop.permute.xlu0 %585  ;;  %v584_v21 = vpop.permute.xlu1 %583 }
 0x499   :  { %v2426_v12 = vpop.eup %2425 }
 0x49a   :  { %v350_v13 = vmul.f32 %v2426_v12, %v2422_v2  ;;  %v1008_v46 = vpop.permute.xlu1 %1007 }
 0x49c   :  { %2213 = vmatmul.mubr.msk.f32.vlgmr.msra.gmra.mrb[6].mxu1 %vm179_vm2, %v350_v13 }
 0x49d   :  { %v2428_v17 = vpop.eup %2427  ;;  %2216 = vmatpush3.msra.mxu1 %v430_v6  ;;  %2217 = vmatprep.mubr.msk.f32.mxu1 %vm2486_vm1, %v2485_v41 }
 0x49e   :  { %v352_v19 = vmul.f32 %v2428_v17, %v2424_v4  ;;  %2220 = vmatprep.subr.mxu1 %v2485_v41 }
 0x4a0   :  { %2218 = vmatmul.mubr.msk.f32.vlgmr.msra.gmra.mrb[8].mxu1 %vm179_vm2, %v352_v19 }
 0x4a1   :  { %2222 = vmatprep.mubr.msk.f32.mxu1 %vm2486_vm1, %v2485_v41 }
 0x4a4   :  { %2221 = vmatpush3.xpose.msk.msra.mxu1 %vm179_vm2, %v508_v7 }
 0x4a5   :  { %2225 = vmatprep.subr.mxu1 %v2485_v41 }
 0x4a7   :  { %2223 = vmatmul.mubr.msk.f32.vlgmr.msra.gmra.mrb[10].mxu1 %vm179_vm2, %v506_v8 }
 0x4a8   :  { %2226 = vmatpush3.xpose.msk.msra.mxu1 %vm179_vm2, %v586_v20  ;;  %2227 = vmatprep.mubr.msk.f32.mxu1 %vm2486_vm1, %v2485_v41 }
 0x4a9   :  { %2235 = vmatprep.subr.mxu1 %v2485_v41 }
 0x4ab   :  { %2228 = vmatmul.mubr.msk.f32.vlgmr.msra.gmra.mrb[12].mxu1 %vm179_vm2, %v584_v21 }
 0x4ac   :  { %2237 = vmatprep.mubr.msk.f32.mxu1 %vm2486_vm1, %v2485_v41 }
 0x56f   :  { %v2642_v22 = vpop.f32.mrb[6].mxu1 }
 0x570   :  { %v2214_v23 = vpop.f32.mrb[7].mxu1 }
 0x573   :  { %v2644_v24 = vpop.f32.mrb[8].mxu1 }
 0x574   :  { %v2219_v25 = vpop.f32.mrb[9].mxu1 }
 0x57a   :  { %v579_v27 = vpop.f32.mrb[10].mxu1 }
 0x57b   :  { %v2224_v28 = vpop.f32.mrb[11].mxu1  ;;  %v580_v43 = vadd.f32 %v579_v27, %v2608_v51 }
 0x57d   :  { %v661_v44 = vsel %vm179_vm2, %v580_v43, -inf }
 0x57e   :  { %v657_v30 = vpop.f32.mrb[12].mxu1 }
 0x57f   :  { %v658_v31 = vadd.f32 %v657_v30, %v2608_v51  ;;  %v2229_v32 = vpop.f32.mrb[13].mxu1 }
 0x581   :  { %v664_v33 = vsel %vm179_vm2, %v658_v31, -inf }
 0x582   :  { %665 = vmax.xlane.f32.xlu0 %v664_v33 }
 0x598   :  { %759 = vrot.lane.b32.xlu0 %v2588_v45, %s2492_s6 }
 0x59c   :  { %1005 = vrot.lane.b32.xlu0 %v2590_v47, %s2493_s7 }
 0x5a0   :  { %1083 = vrot.lane.b32.xlu0 %v2588_v45, %s2493_s7 }
 0x60f   :  { %v666_v34 = vpop.xlane.xlu0 %665 }
 0x610   :  { %v668_v35 = vsub.f32 %v658_v31, %v666_v34 }
 0x612   :  { %v671_v36 = vmul.f32 1.442695, %v668_v35 }
 0x613   :  { %v760_v37 = vpop.permute.xlu0 %759 }
 0x614   :  { %2429 = vpow2.f32 %v671_v36  ;;  %2236 = vmatpush3.msra.mxu1 %v760_v37 }
 0x615   :  { %2250 = vmatprep.subr.mxu1 %v2485_v41 }
 0x617   :  { %v1006_v52 = vpop.permute.xlu0 %1005 }
 0x61b   :  { %v1084_v54 = vpop.permute.xlu0 %1083 }
 0x61e   :  { %v2430_v39 = vpop.eup %2429 }
 0x61f   :  { %v676_v42 = vsel %vm179_vm2, %v2430_v39, 0.0 }
 0x620   :  { %677 = vadd.xlane.f32.xlu1 %v676_v42 }
 0x631   :  { %1085 = vrot.lane.b32.xlu1 %v2588_v45, %s2491_s5 }
 0x655   :  { %662 = vmax.xlane.f32.xlu1 %v661_v44 }
 0x6ad   :  { %v678_v48 = vpop.xlane.xlu1 %677 }
 0x6ae   :  { %2431 = vrcp.f32 %v678_v48 }
 0x6b1   :  { %v1086_v53 = vpop.permute.xlu1 %1085 }
 0x6b8   :  { %v2432_v49 = vpop.eup %2431 }
 0x6b9   :  { %v682_v50 = vmul.f32 %v2432_v49, %v2430_v39 }
 0x6bb   :  { %2238 = vmatmul.mubr.msk.f32.vlgmr.msra.gmra.mrb[14].mxu1 %vm179_vm2, %v682_v50 }
 0x6bc   :  { %2251 = vmatpush3.xpose.msk.msra.mxu1 %vm179_vm2, %v1008_v46  ;;  %2252 = vmatprep.mubr.msk.f32.mxu1 %vm2486_vm1, %v2485_v41 }
 0x6bd   :  { %2255 = vmatprep.subr.mxu1 %v2485_v41 }
 0x6bf   :  { %2253 = vmatmul.mubr.msk.f32.vlgmr.msra.gmra.mrb[16].mxu1 %vm179_vm2, %v1006_v52 }
 0x6c0   :  { %2256 = vmatpush3.xpose.msk.msra.mxu1 %vm179_vm2, %v1086_v53  ;;  %2257 = vmatprep.mubr.msk.f32.mxu1 %vm2486_vm1, %v2485_v41 }
 0x6c1   :  { %2265 = vmatprep.subr.mxu1 %v2485_v41 }
 0x6c3   :  { %2258 = vmatmul.mubr.msk.f32.vlgmr.msra.gmra.mrb[18].mxu1 %vm179_vm2, %v1084_v54 }
 0x6c4   :  { %2267 = vmatprep.mubr.msk.f32.mxu1 %vm2486_vm1, %v2485_v41 }
 0x6e2   :  { %v663_v55 = vpop.xlane.xlu1 %662 }
 0x6e3   :  { %v667_v56 = vsub.f32 %v580_v43, %v663_v55 }
 0x6e5   :  { %v669_v57 = vmul.f32 1.442695, %v667_v56 }
 0x6e7   :  { %2433 = vpow2.f32 %v669_v57 }
 0x6f1   :  { %v2434_v58 = vpop.eup %2433 }
 0x6f2   :  { %v673_v59 = vsel %vm179_vm2, %v2434_v58, 0.0 }
 0x6f3   :  { %674 = vadd.xlane.f32.xlu0 %v673_v59 }
 0x709   :  { %683 = vrot.lane.b32.xlu0 %v2590_v47, %s2492_s6 }
 0x70d   :  { %921 = vrot.lane.b32.xlu0 %v2540_v14, %s2494_s8 }
 0x711   :  { %1183 = vrot.lane.b32.xlu0 %v2590_v47, %s2495_s9 }
 0x715   :  { %1259 = vrot.lane.b32.xlu0 %v2588_v45, %s2495_s9 }
 0x719   :  { %1336 = vrot.lane.b32.xlu0 %v2550_v16, %s2494_s8 }
 0x71d   :  { %1502 = vrot.lane.b32.xlu0 %v2588_v45, %s2496_s10 }
 0x721   :  { %1500 = vrot.lane.b32.xlu0 %v2588_v45, %s2497_s11 }
 0x780   :  { %v675_v60 = vpop.xlane.xlu0 %674 }
 0x781   :  { %2435 = vrcp.f32 %v675_v60 }
 0x784   :  { %v684_v61 = vpop.permute.xlu0 %683 }
 0x785   :  { %2231 = vmatpush3.msra.mxu0 %v684_v61 }
 0x788   :  { %v922_v14 = vpop.permute.xlu0 %921 }
 0x78b   :  { %v2436_v62 = vpop.eup %2435 }
 0x78c   :  { %v1184_v63 = vpop.permute.xlu0 %1183  ;;  %v680_v0 = vmul.f32 %v2436_v62, %v2434_v58 }
 0x78e   :  { %2233 = vmatmul.mubr.msk.f32.vlgmr.msra.gmra.mrb[0].mxu0 %vm179_vm2, %v680_v0  ;;  %v831_v1 = vpop.f32.mrb[14].mxu1 }
 0x78f   :  { %v2239_v16 = vpop.f32.mrb[15].mxu1 }
 0x790   :  { %v1260_v2 = vpop.permute.xlu0 %1259 }
 0x791   :  { %2266 = vmatpush3.msra.mxu1 %v1260_v2 }
 0x792   :  { %v1079_v3 = vpop.f32.mrb[16].mxu1  ;;  %2275 = vmatprep.subr.mxu1 %v2485_v41 }
 0x793   :  { %v1080_v4 = vadd.f32 %v1079_v3, %v2608_v51  ;;  %v2254_v5 = vpop.f32.mrb[17].mxu1 }
 0x794   :  { %v1337_v37 = vpop.permute.xlu0 %1336 }
 0x795   :  { %v1161_v6 = vsel %vm179_vm2, %v1080_v4, -inf }
 0x796   :  { %1162 = vmax.xlane.f32.xlu1 %v1161_v6  ;;  %v1157_v7 = vpop.f32.mrb[18].mxu1 }
 0x797   :  { %v1158_v8 = vadd.f32 %v1157_v7, %v2608_v51  ;;  %v2259_v9 = vpop.f32.mrb[19].mxu1 }
 0x798   :  { %v1503_v43 = vpop.permute.xlu0 %1502 }
 0x799   :  { %v1164_v10 = vsel %vm179_vm2, %v1158_v8, -inf }
 0x79a   :  { %1165 = vmax.xlane.f32.xlu1 %v1164_v10 }
 0x79c   :  { %v1501_v53 = vpop.permute.xlu0 %1500 }
 0x823   :  { %v1163_v11 = vpop.xlane.xlu1 %1162 }
 0x824   :  { %v1167_v12 = vsub.f32 %v1080_v4, %v1163_v11 }
 0x826   :  { %v1169_v13 = vmul.f32 1.442695, %v1167_v12 }
 0x827   :  { %v1166_v17 = vpop.xlane.xlu1 %1165 }
 0x828   :  { %2437 = vpow2.f32 %v1169_v13  ;;  %v1168_v19 = vsub.f32 %v1158_v8, %v1166_v17 }
 0x82a   :  { %v1171_v20 = vmul.f32 1.442695, %v1168_v19 }
 0x82c   :  { %2439 = vpow2.f32 %v1171_v20 }
 0x832   :  { %v2438_v21 = vpop.eup %2437 }
 0x833   :  { %v1173_v23 = vsel %vm179_vm2, %v2438_v21, 0.0 }
 0x834   :  { %1174 = vadd.xlane.f32.xlu1 %v1173_v23 }
 0x836   :  { %v2440_v25 = vpop.eup %2439 }
 0x837   :  { %v1176_v27 = vsel %vm179_vm2, %v2440_v25, 0.0 }
 0x838   :  { %1177 = vadd.xlane.f32.xlu1 %v1176_v27 }
 0x849   :  { %836 = vrot.lane.b32.xlu1 %v2545_v15, %s2494_s8 }
 0x84d   :  { %1424 = vrot.lane.b32.xlu1 %v2590_v47, %s2496_s10 }
 0x851   :  { %1422 = vrot.lane.b32.xlu1 %v2590_v47, %s2497_s11 }
 0x861   :  { %v755_v28 = vpop.f32.mrb[0].mxu0 }
 0x862   :  { %v2234_v30 = vpop.f32.mrb[1].mxu0  ;;  %2242 = vmatprep.mubr.msk.f32.mxu0 %vm179_vm2, %v755_v28 }
 0x8c1   :  { %v1175_v31 = vpop.xlane.xlu1 %1174 }
 0x8c5   :  { %v1178_v32 = vpop.xlane.xlu1 %1177 }
 0x8c6   :  { %2441 = vrcp.f32 %v1178_v32 }
 0x8c7   :  { %2443 = vrcp.f32 %v1175_v31 }
 0x8c9   :  { %v837_v33 = vpop.permute.xlu1 %836 }
 0x8ca   :  { %2240 = vmatprep.subr.mxu0 %v837_v33 }
 0x8cb   :  { %2241 = vmatpush3.msra.mxu0 %v837_v33 }
 0x8cc   :  { %2243 = vmatmul.mubr.msk.f32.vlgmr.msra.gmra.mrb[2].mxu0 %vm179_vm2, %v831_v1  ;;  %2245 = vmatprep.subr.mxu0 %v922_v14 }
 0x8cd   :  { %2247 = vmatprep.mubr.msk.f32.mxu0 %vm179_vm2, %v2642_v22  ;;  %2246 = vmatpush3.msra.mxu0 %v922_v14  ;;  %v1425_v34 = vpop.permute.xlu1 %1424 }
 0x8ce   :  { %2260 = vmatprep.subr.mxu0 %v2485_v41 }
 0x8d0   :  { %v2442_v15 = vpop.eup %2441 }
 0x8d1   :  { %v1182_v35 = vmul.f32 %v2442_v15, %v2440_v25  ;;  %v2444_v36 = vpop.eup %2443  ;;  %v1423_v39 = vpop.permute.xlu1 %1422 }
 0x8d2   :  { %v1180_v22 = vmul.f32 %v2444_v36, %v2438_v21  ;;  %v24_v36 = vld [vmem:[%s2844_s2 + $0x18] sm:$0xff] }
 0x8d3   :  { %2268 = vmatmul.mubr.msk.f32.vlgmr.msra.gmra.mrb[20].mxu1 %vm179_vm2, %v1182_v35  ;;  %v22_v35 = vld [vmem:[%s2844_s2 + $0x8] sm:$0xff] }
 0x8d4   :  { %2276 = vmatpush3.xpose.msk.msra.mxu1 %vm179_vm2, %v1425_v34  ;;  %2248 = vmatmul.mubr.msk.f32.vlgmr.msra.gmra.mrb[2].mxu0 %vm179_vm2, %v2644_v24 }
 0x8d5   :  { %2261 = vmatpush3.msra.mxu0 %v1184_v63  ;;  %2277 = vmatprep.mubr.msk.f32.mxu1 %vm2486_vm1, %v2485_v41 }
 0x8d6   :  { %2262 = vmatprep.mubr.msk.f32.mxu0 %vm2486_vm1, %v2485_v41  ;;  %2270 = vmatprep.subr.mxu0 %v1337_v37 }
 0x8d7   :  { %2278 = vmatmul.mubr.msk.f32.vlgmr.msra.gmra.mrb[22].mxu1 %vm179_vm2, %v1423_v39  ;;  %2285 = vmatprep.subr.mxu1 %v2485_v41  ;;  %v28_v39 = vld [vmem:[%s2844_s2 + $0x38] sm:$0xff] }
 0x8d8   :  { %2263 = vmatmul.mubr.msk.f32.vlgmr.msra.gmra.mrb[4].mxu0 %vm179_vm2, %v1180_v22  ;;  %2287 = vmatprep.mubr.msk.f32.mxu1 %vm2486_vm1, %v2485_v41  ;;  %v26_v22 = vld [vmem:[%s2844_s2 + $0x28] sm:$0xff] }
 0x8d9   :  { %2271 = vmatpush3.msra.mxu0 %v1337_v37  ;;  %v2354_v37 = vpack.c.bf16 %v24_v36, %v22_v35 }
 0x8da   :  { %2280 = vmatprep.subr.mxu0 %v2485_v41 }
 0x9a6   :  { %v1331_v24 = vpop.f32.mrb[20].mxu1 }
 0x9a7   :  { %v2269_v42 = vpop.f32.mrb[21].mxu1 }
 0x9a8   :  { %v29_v42 = vld [vmem:[%s2845_s3] sm:$0xff] }
 0x9aa   :  { %v1496_v44 = vpop.f32.mrb[22].mxu1 }
 0x9ab   :  { %v1497_v46 = vadd.f32 %v1496_v44, %v2608_v51  ;;  %v1255_v48 = vpop.f32.mrb[4].mxu0  ;;  %v2279_v49 = vpop.f32.mrb[23].mxu1  ;;  %v31_v44 = vld [vmem:[%s2845_s3 + $0x10] sm:$0xff] }
 0x9ac   :  { %v2264_v50 = vpop.f32.mrb[5].mxu0  ;;  %2272 = vmatprep.mubr.msk.f32.mxu0 %vm179_vm2, %v1255_v48  ;;  %v32_v48 = vld [vmem:[%s2845_s3 + $0x18] sm:$0xff] }
 0x9ad   :  { %2273 = vmatmul.mubr.msk.f32.vlgmr.msra.gmra.mrb[2].mxu0 %vm179_vm2, %v1331_v24  ;;  %v1578_v52 = vsel %vm179_vm2, %v1497_v46, -inf  ;;  %v2358_v24 = vpack.c.bf16 %v28_v39, %v26_v22  ;;  %v2366_v49 = vpack.c.bf16 %v32_v48, %v31_v44  ;;  %v33_v50 = vld [vmem:[%s2845_s3 + $0x20] sm:$0xff]  ;;  %v1982_v39 = vsub.s32 7, %v2561_v26 }
 0x9ae   :  { %2281 = vmatpush3.xpose.msk.msra.mxu0 %vm179_vm2, %v1503_v43  ;;  %1579 = vmax.xlane.f32.xlu1 %v1578_v52  ;;  %v30_v43 = vld [vmem:[%s2845_s3 + $0x8] sm:$0xff] }
 0x9af   :  { %2282 = vmatprep.mubr.msk.f32.mxu0 %vm2486_vm1, %v2485_v41  ;;  %2290 = vmatprep.subr.mxu0 %v2485_v41  ;;  %v34_v52 = vld [vmem:[%s2845_s3 + $0x28] sm:$0xff] }
 0x9b1   :  { %2283 = vmatmul.mubr.msk.f32.vlgmr.msra.gmra.mrb[6].mxu0 %vm179_vm2, %v1501_v53  ;;  %v2370_v53 = vpack.c.bf16 %v34_v52, %v33_v50 }
 0x9b2   :  { %2292 = vmatprep.mubr.msk.f32.mxu0 %vm2486_vm1, %v2485_v41 }
 0x9bf   :  { %1600 = vrot.lane.b32.xlu1 %v2590_v47, %s2498_s12 }
 0x9c3   :  { %1753 = vrot.lane.b32.xlu1 %v2557_v18, %s2494_s8 }
 0xa3b   :  { %v1580_v54 = vpop.xlane.xlu1 %1579 }
 0xa3c   :  { %v1584_v56 = vsub.f32 %v1497_v46, %v1580_v54  ;;  %v2362_v46 = vpack.c.bf16 %v30_v43, %v29_v42 }
 0xa3e   :  { %v1586_v57 = vmul.f32 1.442695, %v1584_v56 }
 0xa3f   :  { %v1601_v55 = vpop.permute.xlu1 %1600 }
 0xa40   :  { %2286 = vmatpush3.msra.mxu1 %v1601_v55  ;;  %2445 = vpow2.f32 %v1586_v57 }
 0xa41   :  { %2355 = vmatprep.subr.bf16.mxu1 %v2354_v37 }
 0xa43   :  { %v1754_v3 = vpop.permute.xlu1 %1753 }
 0xa4a   :  { %v2446_v14 = vpop.eup %2445 }
 0xa4b   :  { %v1590_v41 = vsel %vm179_vm2, %v2446_v14, 0.0 }
 0xa84   :  { %v1574_v58 = vpop.f32.mrb[6].mxu0 }
 0xa85   :  { %v1575_v59 = vadd.f32 %v1574_v58, %v2608_v51  ;;  %v2284_v60 = vpop.f32.mrb[7].mxu0 }
 0xa86   :  { %v1875_v60 = vsub.s32 4, %v2561_v26 }
 0xa87   :  { %v1581_v61 = vsel %vm179_vm2, %v1575_v59, -inf }
 0xa88   :  { %1582 = vmax.xlane.f32.xlu0 %v1581_v61  ;;  %v1881_v61 = vsub.s32 5, %v2561_v26 }
 0xa8c   :  { %1591 = vadd.xlane.f32.xlu0 %v1590_v41 }
 0xb15   :  { %v1583_v47 = vpop.xlane.xlu0 %1582 }
 0xb16   :  { %v1585_v62 = vsub.f32 %v1575_v59, %v1583_v47 }
 0xb18   :  { %v1588_v18 = vmul.f32 1.442695, %v1585_v62 }
 0xb19   :  { %v1592_v63 = vpop.xlane.xlu0 %1591 }
 0xb1a   :  { %2447 = vpow2.f32 %v1588_v18 }
 0xb1b   :  { %2449 = vrcp.f32 %v1592_v63  ;;  %v1882_v63 = vrot.slane %v2567_v29, %v1881_v61 }
 0xb24   :  { %v2448_v0 = vpop.eup %2447 }
 0xb25   :  { %v2450_v1 = vpop.eup %2449  ;;  %v1593_v16 = vsel %vm179_vm2, %v2448_v0, 0.0 }
 0xb26   :  { %v1597_v2 = vmul.f32 %v2450_v1, %v2446_v14  ;;  %1594 = vadd.xlane.f32.xlu0 %v1593_v16  ;;  %v1876_v14 = vrot.slane %v2567_v29, %v1875_v60 }
 0xb28   :  { %2288 = vmatmul.mubr.msk.f32.vlgmr.msra.gmra.mrb[24].mxu1 %vm179_vm2, %v1597_v2 }
 0xb29   :  { %2357 = vmatpush3.bf16.msra.mxu1 %v2354_v37 }
 0xb2a   :  { %2359 = vmatprep.subr.bf16.mxu1 %v2358_v24 }
 0xb2d   :  { %2361 = vmatpush3.bf16.msra.mxu1 %v2358_v24  ;;  %v1983_v24 = vrot.slane %v2567_v29, %v1982_v39 }
 0xb3c   :  { %1676 = vrot.lane.b32.xlu0 %v2588_v45, %s2498_s12  ;;  %v1841_v45 = vsub.s32 3, %v2561_v26 }
 0xb3e   :  { %v1842_v11 = vrot.slane %v2567_v29, %v1841_v45  ;;  %v41_v45 = vld [vmem:[%s2845_s3 + $0x60] sm:$0xff] }
 0xbb3   :  { %v1595_v51 = vpop.xlane.xlu0 %1594 }
 0xbb4   :  { %2451 = vrcp.f32 %v1595_v51  ;;  %v35_v51 = vld [vmem:[%s2845_s3 + $0x30] sm:$0xff] }
 0xbb7   :  { %v1677_v4 = vpop.permute.xlu0 %1676 }
 0xbb8   :  { %2291 = vmatpush3.msra.mxu0 %v1677_v4 }
 0xbb9   :  { %2295 = vmatprep.subr.mxu0 %v1754_v3 }
 0xbbe   :  { %v2452_v5 = vpop.eup %2451 }
 0xbbf   :  { %v1599_v6 = vmul.f32 %v2452_v5, %v2448_v0  ;;  %v37_v5 = vld [vmem:[%s2845_s3 + $0x40] sm:$0xff] }
 0xbc1   :  { %2293 = vmatmul.mubr.msk.f32.vlgmr.msra.gmra.mrb[8].mxu0 %vm179_vm2, %v1599_v6  ;;  %v38_v6 = vld [vmem:[%s2845_s3 + $0x48] sm:$0xff] }
 0xbc2   :  { %2296 = vmatpush3.msra.mxu0 %v1754_v3  ;;  %v36_v3 = vld [vmem:[%s2845_s3 + $0x38] sm:$0xff] }
 0xbc3   :  { %2363 = vmatprep.subr.bf16.mxu0 %v2362_v46  ;;  %v2374_v4 = vpack.c.bf16 %v36_v3, %v35_v51 }
 0xbfb   :  { %v1672_v7 = vpop.f32.mrb[24].mxu1 }
 0xbfc   :  { %v2289_v8 = vpop.f32.mrb[25].mxu1  ;;  %2297 = vmatprep.mubr.msk.f32.mxu0 %vm179_vm2, %v1672_v7  ;;  %v2378_v7 = vpack.c.bf16 %v38_v6, %v37_v5 }
 0xbfd   :  { %v39_v8 = vld [vmem:[%s2845_s3 + $0x50] sm:$0xff] }
 0xc94   :  { %v1748_v9 = vpop.f32.mrb[8].mxu0 }
 0xc95   :  { %v2294_v10 = vpop.f32.mrb[9].mxu0  ;;  %2298 = vmatmul.mubr.msk.f32.vlgmr.msra.gmra.mrb[2].mxu0 %vm179_vm2, %v1748_v9  ;;  %v40_v9 = vld [vmem:[%s2845_s3 + $0x58] sm:$0xff] }
 0xc96   :  { %2365 = vmatpush3.bf16.msra.mxu0 %v2362_v46  ;;  %v2382_v10 = vpack.c.bf16 %v40_v9, %v39_v8 }
 0xc97   :  { %2367 = vmatprep.subr.bf16.mxu0 %v2366_v49 }
 0xc9a   :  { %2369 = vmatpush3.bf16.msra.mxu0 %v2366_v49 }
 0xc9b   :  { %2371 = vmatprep.subr.bf16.mxu0 %v2370_v53 }
 0xc9e   :  { %2373 = vmatpush3.bf16.msra.mxu0 %v2370_v53 }
 0xc9f   :  { %2375 = vmatprep.subr.bf16.mxu0 %v2374_v4 }
 0xca2   :  { %2377 = vmatpush3.bf16.msra.mxu0 %v2374_v4 }
 0xca3   :  { %2379 = vmatprep.subr.bf16.mxu0 %v2378_v7 }
 0xca6   :  { %2381 = vmatpush3.bf16.msra.mxu0 %v2378_v7 }
 0xca7   :  { %2383 = vmatprep.subr.bf16.mxu0 %v2382_v10 }
 0xcaa   :  { %2385 = vmatpush3.bf16.msra.mxu0 %v2382_v10 }
 0xd68   :  { %v2299_v12 = vpop.f32.mrb[2].mxu0 }
 0xd69   :  { %v1844_v13 = vadd.f32 %v2299_v12, %v1842_v11  ;;  %v1828_v17 = vpop.f32.mrb[3].mxu0 }
 0xd6a   :  { %v1843_v19 = vadd.f32 %v1842_v11, %v1828_v17  ;;  %v42_v11 = vld [vmem:[%s2845_s3 + $0x68] sm:$0xff]  ;;  %v44_v17 = vld [vmem:[%s2845_s3 + $0x78] sm:$0xff] }
 0xd6b   :  { %v2743_v20 = vadd.f32 %v1844_v13, %v2576_v40  ;;  %v2386_v12 = vpack.c.bf16 %v42_v11, %v41_v45  ;;  %v43_v13 = vld [vmem:[%s2845_s3 + $0x70] sm:$0xff]  ;;  %s2499_s3 = smov [#allocation2]  }
 0xd6c   :  { %v2746_v21 = vadd.f32 %v1843_v19, %v2572_v38  ;;  %v2390_v19 = vpack.c.bf16 %v44_v17, %v43_v13  ;;  %s2068_s23 = sshll.u32 %s2499_s3, 4  ;;  %s2069_s23 = int_to_ptr.vmem [resolvable:$true] %s2068_s23 }
 0xd6d   :  { %v1850_v23 = vsel %vm45_vm0, %v2743_v20, 0.0  ;;  %2387 = vmatprep.subr.bf16.mxu0 %v2386_v12  ;;  %s2461_s24 = scalar_lea.vmem %s2069_s23, 256  ;;  %p2466_p1 = scmp.lt.s32.totalorder %s2069_s23, %s2069_s23 }
 0xd6e   :  { %1851 = vadd.xlane.f32.xlu0 %v1850_v23  ;;  %v1847_v25 = vsel %vm45_vm0, %v2746_v21, 0.0  ;;  %2389 = vmatpush3.bf16.msra.mxu0 %v2386_v12  ;;  %v1887_v23 = vsub.s32 6, %v2561_v26  ;;  %p2462_p0 = scmp.ne.s32.totalorder %s2069_s23, %s2461_s24  ;;  %p2467_p2 = scmp.lt.s32.totalorder %s2461_s24, %s2461_s24 }
 0xd6f   :  { %1848 = vadd.xlane.f32.xlu1 %v1847_v25  ;;  %2391 = vmatprep.subr.bf16.mxu0 %v2390_v19 }
 0xd70   :  { %v1888_v25 = vrot.slane %v2567_v29, %v1887_v23  ;;  %p2468_p3 = por %p2467_p2, %p2466_p1 }
 0xd72   :  { %2393 = vmatpush3.bf16.msra.mxu0 %v2390_v19  ;;  %p2469_p4 = pnand %p2468_p3, %p2462_p0 }
 0xdfb   :  { %v1852_v27 = vpop.xlane.xlu0 %1851 }
 0xdfc   :  { %v1854_v28 = vmul.f32 0.03125, %v1852_v27  ;;  %v1849_v30 = vpop.xlane.xlu1 %1848 }
 0xdfd   :  { %v1853_v31 = vmul.f32 0.03125, %v1849_v30 }
 0xdfe   :  { %v1856_v32 = vsub.f32 %v2743_v20, %v1854_v28 }
 0xdff   :  { %v1855_v40 = vsub.f32 %v2746_v21, %v1853_v31 }
 0xe00   :  { %v1858_v33 = vmul.f32 %v1856_v32, %v1856_v32 }
 0xe01   :  { %v1857_v15 = vmul.f32 %v1855_v40, %v1855_v40 }
 0xe02   :  { %v1862_v38 = vsel %vm45_vm0, %v1858_v33, 0.0 }
 0xe03   :  { %1863 = vadd.xlane.f32.xlu1 %v1862_v38  ;;  %v1859_v34 = vsel %vm45_vm0, %v1857_v15, 0.0 }
 0xe04   :  { %1860 = vadd.xlane.f32.xlu0 %v1859_v34 }
 0xe90   :  { %v1864_v54 = vpop.xlane.xlu1 %1863 }
 0xe91   :  { %v1866_v55 = vmul.f32 0.03125, %v1864_v54  ;;  %v1861_v56 = vpop.xlane.xlu0 %1860 }
 0xe92   :  { %v1865_v57 = vmul.f32 0.03125, %v1861_v56 }
 0xe93   :  { %v1868_v58 = vadd.f32 1e-05, %v1866_v55 }
 0xe94   :  { %v1867_v59 = vadd.f32 1e-05, %v1865_v57 }
 0xe95   :  { %2453 = vrsqrt.f32 %v1868_v58 }
 0xe96   :  { %2455 = vrsqrt.f32 %v1867_v59 }
 0xe9f   :  { %v2454_v41 = vpop.eup %2453 }
 0xea0   :  { %v2456_v47 = vpop.eup %2455  ;;  %v1872_v62 = vmul.f32 %v2454_v41, %v1856_v32 }
 0xea1   :  { %v1871_v18 = vmul.f32 %v2456_v47, %v1855_v40 }
 0xea2   :  { %v1878_v0 = vmul.f32 %v1876_v14, %v1872_v62 }
 0xea3   :  { %v1877_v1 = vmul.f32 %v1876_v14, %v1871_v18 }
 0xea4   :  { %v1884_v2 = vadd.f32 %v1882_v63, %v1878_v0 }
 0xea5   :  { %v1883_v16 = vadd.f32 %v1882_v63, %v1877_v1 }
 0xea7   :  { %2308 = vmatprep.mubr.msk.f32.mxu1 %vm45_vm0, %v1883_v16 }
 0xea8   :  { %2309 = vmatmul.mubr.msk.f32.vlgmr.msra.gmra.mrb[26].mxu1 %vm45_vm0, %v1884_v2 }
 0xf7b   :  { %v2310_v27 = vpop.f32.mrb[26].mxu1 }
 0xf7c   :  { %v1967_v28 = vadd.f32 %v2310_v27, %v1888_v25  ;;  %v1961_v30 = vpop.f32.mrb[27].mxu1 }
 0xf7d   :  { %v1962_v31 = vadd.f32 %v1961_v30, %v1888_v25 }
 0xf7e   :  { %v1973_v32 = vmul.f32 0.70710677, %v1967_v28  ;;  %v1971_v36 = vmul.f32 0.5, %v1967_v28 }
 0xf7f   :  { %v1972_v40 = vmul.f32 0.70710677, %v1962_v31  ;;  %v1970_v34 = vmul.f32 0.5, %v1962_v31 }
 0xf80   :  { %2457 = verf.f32 %v1973_v32 }
 0xf81   :  { %2459 = verf.f32 %v1972_v40 }
 0xf8a   :  { %v2458_v33 = vpop.eup %2457 }
 0xf8b   :  { %v2460_v15 = vpop.eup %2459  ;;  %v1977_v38 = vadd.f32 1.0, %v2458_v33 }
 0xf8c   :  { %v1976_v35 = vadd.f32 1.0, %v2460_v15 }
 0xf8d   :  { %v1979_v22 = vmul.f32 %v1977_v38, %v1971_v36 }
 0xf8e   :  { %v1978_v37 = vmul.f32 %v1976_v35, %v1970_v34 }
 0xf90   :  { %2343 = vmatprep.mubr.f32.mxu0 %v1978_v37 }
 0xf91   :  { %2344 = vmatmul.mubr.f32.vlgmr.msra.gmra.mrb[10].mxu0 %v1979_v22 }
0x1064   :  { %v2345_v42 = vpop.f32.mrb[10].mxu0 }
0x1065   :  { %v2056_v43 = vadd.f32 %v2345_v42, %v1983_v24  ;;  %v2050_v44 = vpop.f32.mrb[11].mxu0 }
0x1066   :  { %v2051_v46 = vadd.f32 %v2050_v44, %v1983_v24 }
0x1067   :  { %v2060_v48 = vadd.f32 %v2056_v43, %v2743_v20 }
0x1068   :  { %v2059_v49 = vadd.f32 %v2051_v46, %v2746_v21 }
0x1069   :  { %2062 = vst.msk [vmem:[#allocation2 + $0x8] sm:$0xff] %vm45_vm0, %v2060_v48 }
0x106a   :  { %2061 = vst.msk [vmem:[#allocation2] sm:$0xff] %vm45_vm0, %v2059_v49 }
0x106b   :  { %2472 = shalt.err (!%p2469_p4)
}
0x106c   :  { %s2473_s2 = scalar_lea.hbm %s2846_s4, 256 }
0x106d   :  { %p2474_p5 = scmp.ne.s32.totalorder %s2846_s4, %s2473_s2  ;;  %p2477_p6 = scmp.lt.u32.totalorder %s2473_s2, %s2846_s4 }
0x106f   :  { %p2479_p7 = pnand %p2477_p6, %p2474_p5 }
0x1071   :  { %2482 = shalt.err (!%p2479_p7)
}
0x1072   :  { %s2500_s30 = smov 128   ;;  %s2501_s5 = smov 8  }
0x1073   :  { %2074 = dma.vmem_to_hbm [thread:$0]  %s2069_s23, 256, %s2846_s4, [#allocation3], %s2500_s30, %s2500_s30, %s2501_s5  }
0x1074   :  { %2483 = dma.done.wait [#allocation3], 256  }
0x1075   :  { %2484 = vsyncadd [#allocation3], 4294967040 }
0x1076   :  { %2078 = vsyncpa [#allocation3], 1 }

</bundles_post_ra>
